<compile_context>
chip_gen: v7x
topology: tpu7x:2x2x1
jax: 0.10.0
libtpu: 0.0.40
codegen_flags: <defaults>
</compile_context>

<pallas_src>
import functools

import jax
import jax.numpy as jnp
from jax.experimental import pallas as pl
from jax.experimental.pallas import tpu as pltpu


def _round_up(x, n):
    return ((x + n - 1) // n) * n


def _supcon_kernel(gid_row_ref, gid_col_ref, feat_row_ref, feat_colT_ref,
                   out_ref, m_scr, l_scr, s_scr, c_scr, *,
                   inv_temp, loss_scale, margin, n_rows, n_cols):
    i = pl.program_id(0)          # anchor (row) block  -- "parallel"
    j = pl.program_id(1)          # contrast (col) block -- reduction, "arbitrary"

    tq = feat_row_ref.shape[0]
    tk = feat_colT_ref.shape[1]

    @pl.when(j == 0)
    def _():
        m_scr[...] = jnp.full(m_scr.shape, -1e30, jnp.float32)
        l_scr[...] = jnp.zeros(l_scr.shape, jnp.float32)
        s_scr[...] = jnp.zeros(s_scr.shape, jnp.float32)
        c_scr[...] = jnp.zeros(c_scr.shape, jnp.float32)

    # Tile of anchor . contrast^T (bf16 operands, f32 MXU accumulation).
    sim = jnp.dot(feat_row_ref[...], feat_colT_ref[...],
                  preferred_element_type=jnp.float32)

    # Positive mask rebuilt in-kernel from group ids (no N x N mask DMA).
    pos = gid_row_ref[...] == gid_col_ref[...]      # (tq,1) == (1,tk) -> (tq,tk)

    if margin != 0.0:
        adc = sim * inv_temp - pos.astype(jnp.float32) * (margin * inv_temp)
    else:  # specialize the common m == 0 path (skip the N^2 multiply)
        adc = sim * inv_temp

    rows = jax.lax.broadcasted_iota(jnp.int32, (tq, tk), 0) + i * tq
    cols = jax.lax.broadcasted_iota(jnp.int32, (tq, tk), 1) + j * tk
    valid = jnp.logical_and(rows != cols, cols < n_cols)   # no self-contrast / padding

    adc_masked = jnp.where(valid, adc, -1e30)

    # Online logsumexp over contrast columns.
    m_prev = m_scr[...]
    m_new = jnp.maximum(m_prev, jnp.max(adc_masked, axis=1, keepdims=True))
    p = jnp.where(valid, jnp.exp(adc - m_new), 0.0)
    l_scr[...] = l_scr[...] * jnp.exp(m_prev - m_new) + jnp.sum(p, axis=1, keepdims=True)
    m_scr[...] = m_new

    pos_valid = jnp.logical_and(pos, valid)
    s_scr[...] += jnp.sum(jnp.where(pos_valid, adc, 0.0), axis=1, keepdims=True)
    c_scr[...] += jnp.sum(pos_valid.astype(jnp.float32), axis=1, keepdims=True)

    @pl.when(j == pl.num_programs(1) - 1)
    def _():
        lse = m_scr[...] + jnp.log(l_scr[...])
        cnt = c_scr[...]
        # sum(pos * log_prob) = sum(pos * adc) - cnt * LSE  (exact decomposition)
        mean_log_prob_pos = (s_scr[...] - cnt * lse) / cnt
        loss_row = loss_scale * mean_log_prob_pos            # (tq, 1)
        row_ids = jax.lax.broadcasted_iota(jnp.int32, (tq, 1), 0) + i * tq
        out_ref[...] = jnp.where(row_ids < n_rows, loss_row, 0.0)


def supcon_loss(features, labels=None, mask=None, temperature=0.07,
                contrast_mode='all', base_temperature=0.07, m=0.0,
                block_q=256, block_k=512, matmul_dtype=jnp.bfloat16):
    """Pallas implementation of SupConLoss.forward (labels / SimCLR-default paths)."""
    if features.ndim < 3:
        raise ValueError('`features` needs to be [bsz, n_views, ...]')
    if features.ndim > 3:
        features = features.reshape(features.shape[0], features.shape[1], -1)
    bsz, n_views, dim = features.shape

    if labels is not None and mask is not None:
        raise ValueError('Cannot define both `labels` and `mask`')
    if mask is not None:
        # TODO(synk): arbitrary user-provided [bsz, bsz] masks are not supported by
        # the label-compare fast path (only `labels` / default SimCLR identity mask).
        raise NotImplementedError('explicit `mask` argument not supported')
    if labels is None:
        gid = jnp.arange(bsz, dtype=jnp.int32)           # SimCLR: identity mask
    else:
        labels = jnp.asarray(labels).reshape(-1)
        if labels.shape[0] != bsz:
            raise ValueError('Num of labels does not match num of features')
        gid = labels.astype(jnp.int32)

    # contrast_feature = cat(unbind(features, dim=1), dim=0): view-major [N, D]
    cf = jnp.transpose(features, (1, 0, 2)).reshape(n_views * bsz, dim)
    n_contrast = n_views * bsz
    gid_contrast = jnp.tile(gid, (n_views,))

    if contrast_mode == 'all':
        anchor_feat, gid_anchor, n_anchor = cf, gid_contrast, n_contrast
    elif contrast_mode == 'one':
        anchor_feat, gid_anchor, n_anchor = cf[:bsz], gid, bsz
    else:
        raise ValueError('Unknown mode: {}'.format(contrast_mode))

    # Tile sizes clamped to the (padded) problem size; (8, 128) alignment kept.
    block_q = min(block_q, _round_up(n_anchor, 8))
    block_k = min(block_k, _round_up(n_contrast, 128))
    nq_pad = _round_up(n_anchor, block_q)
    nk_pad = _round_up(n_contrast, block_k)

    # Padded operands; contrast side pre-transposed to [D, N] so the kernel never
    # transposes tiles.  Matmul operands in bf16, everything else in f32.
    a_feat = jnp.zeros((nq_pad, dim), matmul_dtype).at[:n_anchor].set(
        anchor_feat.astype(matmul_dtype))
    c_featT = jnp.zeros((dim, nk_pad), matmul_dtype).at[:, :n_contrast].set(
        cf.astype(matmul_dtype).T)
    gid_rows = jnp.full((nq_pad, 1), -1, jnp.int32).at[:n_anchor, 0].set(gid_anchor)
    gid_cols = jnp.full((1, nk_pad), -2, jnp.int32).at[0, :n_contrast].set(gid_contrast)

    kernel = functools.partial(
        _supcon_kernel,
        inv_temp=float(1.0 / temperature),
        loss_scale=float(-(temperature / base_temperature)),
        margin=float(m),
        n_rows=int(n_anchor),
        n_cols=int(n_contrast),
    )

    grid = (nq_pad // block_q, nk_pad // block_k)

    per_row = pl.pallas_call(
        kernel,
        out_shape=jax.ShapeDtypeStruct((nq_pad, 1), jnp.float32),
        grid_spec=pltpu.PrefetchScalarGridSpec(
            num_scalar_prefetch=0,
            grid=grid,
            in_specs=[
                pl.BlockSpec((block_q, 1), lambda i, j: (i, 0)),      # anchor group ids
                pl.BlockSpec((1, block_k), lambda i, j: (0, j)),      # contrast group ids
                pl.BlockSpec((block_q, dim), lambda i, j: (i, 0)),    # anchor features
                pl.BlockSpec((dim, block_k), lambda i, j: (0, j)),    # contrast features^T
            ],
            out_specs=pl.BlockSpec((block_q, 1), lambda i, j: (i, 0)),
            scratch_shapes=[pltpu.VMEM((block_q, 1), jnp.float32) for _ in range(4)],
        ),
        compiler_params=pltpu.CompilerParams(
            dimension_semantics=("parallel", "arbitrary")),
    )(gid_rows, gid_cols, a_feat, c_featT)

    # Final tiny reduction (padded rows were written as 0).
    return jnp.sum(per_row) / n_anchor


def _supcon_loss_ref(features, labels=None, temperature=0.07, contrast_mode='all',
                     base_temperature=0.07, m=0.0, matmul_dtype=jnp.float32):
    """Pure-JAX mirror of the PyTorch SupConLoss.forward for validation."""
    bsz, n_views = features.shape[:2]
    features = features.reshape(bsz, n_views, -1)
    if labels is None:
        mask = jnp.eye(bsz, dtype=jnp.float32)
    else:
        labels = labels.reshape(-1, 1)
        mask = (labels == labels.T).astype(jnp.float32)
    cf = jnp.transpose(features, (1, 0, 2)).reshape(n_views * bsz, -1)
    if contrast_mode == 'one':
        anchor, anchor_count = cf[:bsz], 1
    else:
        anchor, anchor_count = cf, n_views
    mask = jnp.tile(mask, (anchor_count, n_views))
    sim = jnp.dot(anchor.astype(matmul_dtype), cf.astype(matmul_dtype).T,
                  preferred_element_type=jnp.float32)
    adc = (sim - mask * m) / temperature
    logits = adc - jnp.max(adc, axis=1, keepdims=True)
    n_a, n_c = anchor_count * bsz, n_views * bsz
    logits_mask = (jnp.arange(n_a)[:, None] != jnp.arange(n_c)[None, :]).astype(jnp.float32)
    mask = mask * logits_mask
    exp_logits = jnp.exp(logits) * logits_mask
    log_prob = logits - jnp.log(jnp.sum(exp_logits, axis=1, keepdims=True))
    mlpp = jnp.sum(mask * log_prob, axis=1) / jnp.sum(mask, axis=1)
    return jnp.mean(-(temperature / base_temperature) * mlpp)


if __name__ == "__main__":
    key = jax.random.PRNGKey(0)
    k1, k2, k3, k4 = jax.random.split(key, 4)

    # Small case: bsz=8, n_views=2, dim=32 (single tile).
    bsz, n_views, dim = 8, 2, 32
    feats = jax.random.normal(k1, (bsz, n_views, dim), jnp.float32)
    feats = feats / jnp.linalg.norm(feats, axis=-1, keepdims=True)
    labels = jax.random.randint(k2, (bsz,), 0, 4)

    for m_val in (0.0, 0.1):
        loss = jax.block_until_ready(supcon_loss(feats, labels=labels, m=m_val))
        ref_b = _supcon_loss_ref(feats, labels, m=m_val, matmul_dtype=jnp.bfloat16)
        ref_f = _supcon_loss_ref(feats, labels, m=m_val, matmul_dtype=jnp.float32)
        assert jnp.allclose(loss, ref_b, rtol=1e-3, atol=1e-3), (m_val, loss, ref_b)
        assert jnp.allclose(loss, ref_f, rtol=5e-2, atol=5e-2), (m_val, loss, ref_f)

    # SimCLR path (labels=None -> identity mask) and contrast_mode='one'.
    loss_u = jax.block_until_ready(supcon_loss(feats))
    ref_u = _supcon_loss_ref(feats, None, matmul_dtype=jnp.bfloat16)
    assert jnp.allclose(loss_u, ref_u, rtol=1e-3, atol=1e-3), (loss_u, ref_u)

    loss_one = jax.block_until_ready(supcon_loss(feats, labels=labels, contrast_mode='one'))
    ref_one = _supcon_loss_ref(feats, labels, contrast_mode='one', matmul_dtype=jnp.bfloat16)
    assert jnp.allclose(loss_one, ref_one, rtol=1e-3, atol=1e-3), (loss_one, ref_one)

    # Multi-tile case: exercises online-LSE accumulation across column blocks,
    # multiple (parallel) row blocks and column padding.
    bsz2 = 96
    feats2 = jax.random.normal(k3, (bsz2, n_views, dim), jnp.float32)
    feats2 = feats2 / jnp.linalg.norm(feats2, axis=-1, keepdims=True)
    labels2 = jax.random.randint(k4, (bsz2,), 0, 6)
    loss2 = jax.block_until_ready(
        supcon_loss(feats2, labels=labels2, m=0.1, block_q=64, block_k=128))
    ref2 = _supcon_loss_ref(feats2, labels2, m=0.1, matmul_dtype=jnp.bfloat16)
    assert jnp.allclose(loss2, ref2, rtol=1e-3, atol=1e-3), (loss2, ref2)

    print("KERNEL_OK")
</pallas_src>

<mosaic_0001>
module attributes {stable_mosaic.version = 11 : i64} {
  func.func @_supcon_kernel(%arg0: i32, %arg1: i32, %arg2: memref<16x1xi32, #tpu.memory_space<vmem>>, %arg3: memref<1x128xi32, #tpu.memory_space<vmem>>, %arg4: memref<16x32xbf16, #tpu.memory_space<vmem>>, %arg5: memref<32x128xbf16, #tpu.memory_space<vmem>>, %arg6: memref<16x1xf32, #tpu.memory_space<vmem>>, %arg7: memref<16x1xf32, #tpu.memory_space<vmem>>, %arg8: memref<16x1xf32, #tpu.memory_space<vmem>>, %arg9: memref<16x1xf32, #tpu.memory_space<vmem>>, %arg10: memref<16x1xf32, #tpu.memory_space<vmem>>) attributes {dimension_semantics = [#tpu.dimension_semantics<parallel>, #tpu.dimension_semantics<arbitrary>], iteration_bounds = array<i64: 1, 1>, scalar_prefetch = 0 : i64, scratch_operands = 4 : i64, tpu.core_type = #tpu.core_type<tc>, window_params = [{transform_indices = @transform_0, window_bounds = array<i64: 16, 1>}, {transform_indices = @transform_1, window_bounds = array<i64: 1, 128>}, {transform_indices = @transform_2, window_bounds = array<i64: 16, 32>}, {transform_indices = @transform_3, window_bounds = array<i64: 32, 128>}, {transform_indices = @transform_4, window_bounds = array<i64: 16, 1>}]} {
    %c0_i32 = arith.constant 0 : i32
    %0 = arith.cmpi eq, %arg1, %c0_i32 : i32
    %1 = arith.extui %0 : i1 to i32
    %c0_i32_0 = arith.constant 0 : i32
    %2 = arith.cmpi ne, %1, %c0_i32_0 : i32
    scf.if %2 {
      %cst_35 = arith.constant -1.000000e+30 : f32
      %63 = vector.broadcast %cst_35 : f32 to vector<16x1xf32>
      %c0_36 = arith.constant 0 : index
      %c0_37 = arith.constant 0 : index
      %64 = vector.load %arg7[%c0_36, %c0_37] : memref<16x1xf32, #tpu.memory_space<vmem>>, vector<16x1xf32>
      tpu.vector_store %arg7[%c0_36, %c0_37], %63 {strides = array<i32>} : memref<16x1xf32, #tpu.memory_space<vmem>>, vector<16x1xf32>,
      %cst_38 = arith.constant 0.000000e+00 : f32
      %65 = vector.broadcast %cst_38 : f32 to vector<16x1xf32>
      %c0_39 = arith.constant 0 : index
      %c0_40 = arith.constant 0 : index
      %66 = vector.load %arg8[%c0_39, %c0_40] : memref<16x1xf32, #tpu.memory_space<vmem>>, vector<16x1xf32>
      tpu.vector_store %arg8[%c0_39, %c0_40], %65 {strides = array<i32>} : memref<16x1xf32, #tpu.memory_space<vmem>>, vector<16x1xf32>,
      %cst_41 = arith.constant 0.000000e+00 : f32
      %67 = vector.broadcast %cst_41 : f32 to vector<16x1xf32>
      %c0_42 = arith.constant 0 : index
      %c0_43 = arith.constant 0 : index
      %68 = vector.load %arg9[%c0_42, %c0_43] : memref<16x1xf32, #tpu.memory_space<vmem>>, vector<16x1xf32>
      tpu.vector_store %arg9[%c0_42, %c0_43], %67 {strides = array<i32>} : memref<16x1xf32, #tpu.memory_space<vmem>>, vector<16x1xf32>,
      %cst_44 = arith.constant 0.000000e+00 : f32
      %69 = vector.broadcast %cst_44 : f32 to vector<16x1xf32>
      %c0_45 = arith.constant 0 : index
      %c0_46 = arith.constant 0 : index
      %70 = vector.load %arg10[%c0_45, %c0_46] : memref<16x1xf32, #tpu.memory_space<vmem>>, vector<16x1xf32>
      tpu.vector_store %arg10[%c0_45, %c0_46], %69 {strides = array<i32>} : memref<16x1xf32, #tpu.memory_space<vmem>>, vector<16x1xf32>,
    } else {
    }
    %c0 = arith.constant 0 : index
    %c0_1 = arith.constant 0 : index
    %3 = vector.load %arg4[%c0, %c0_1] : memref<16x32xbf16, #tpu.memory_space<vmem>>, vector<16x32xbf16>
    %c0_2 = arith.constant 0 : index
    %c0_3 = arith.constant 0 : index
    %4 = vector.load %arg5[%c0_2, %c0_3] : memref<32x128xbf16, #tpu.memory_space<vmem>>, vector<32x128xbf16>
    %cst = arith.constant dense<0.000000e+00> : vector<16x128xf32>
    %5 = tpu.matmul %3, %4, %cst {dimension_numbers = #tpu.dot_dimension_numbers<[1], [0], [0], [1], [0, 0, 1, 1], [], []>} : vector<16x32xbf16>, vector<32x128xbf16>, vector<16x128xf32> -> vector<16x128xf32>
    %c0_4 = arith.constant 0 : index
    %c0_5 = arith.constant 0 : index
    %6 = vector.load %arg2[%c0_4, %c0_5] : memref<16x1xi32, #tpu.memory_space<vmem>>, vector<16x1xi32>
    %c0_6 = arith.constant 0 : index
    %c0_7 = arith.constant 0 : index
    %7 = vector.load %arg3[%c0_6, %c0_7] : memref<1x128xi32, #tpu.memory_space<vmem>>, vector<1x128xi32>
    %8 = vector.broadcast %6 : vector<16x1xi32> to vector<16x128xi32>
    %9 = vector.broadcast %7 : vector<1x128xi32> to vector<16x128xi32>
    %10 = arith.cmpi eq, %8, %9 : vector<16x128xi32>
    %cst_8 = arith.constant 14.2857141 : f32
    %11 = vector.broadcast %cst_8 : f32 to vector<16x128xf32>
    %12 = arith.mulf %5, %11 : vector<16x128xf32>
    %13 = tpu.iota {dimensions = array<i32: 0>} : vector<16x128xi32>
    %c16_i32 = arith.constant 16 : i32
    %14 = arith.muli %arg0, %c16_i32 : i32
    %15 = vector.broadcast %14 : i32 to vector<16x128xi32>
    %16 = arith.addi %13, %15 : vector<16x128xi32>
    %17 = tpu.iota {dimensions = array<i32: 1>} : vector<16x128xi32>
    %c128_i32 = arith.constant 128 : i32
    %18 = arith.muli %arg1, %c128_i32 : i32
    %19 = vector.broadcast %18 : i32 to vector<16x128xi32>
    %20 = arith.addi %17, %19 : vector<16x128xi32>
    %21 = arith.cmpi ne, %16, %20 : vector<16x128xi32>
    %c16_i32_9 = arith.constant 16 : i32
    %22 = vector.broadcast %c16_i32_9 : i32 to vector<16x128xi32>
    %23 = arith.cmpi slt, %20, %22 : vector<16x128xi32>
    %24 = arith.andi %21, %23 : vector<16x128xi1>
    %cst_10 = arith.constant -1.000000e+30 : f32
    %25 = vector.broadcast %cst_10 : f32 to vector<16x128xf32>
    %26 = arith.select %24, %12, %25 : vector<16x128xi1>, vector<16x128xf32>
    %c0_11 = arith.constant 0 : index
    %c0_12 = arith.constant 0 : index
    %27 = vector.load %arg7[%c0_11, %c0_12] : memref<16x1xf32, #tpu.memory_space<vmem>>, vector<16x1xf32>
    %cst_13 = arith.constant dense<0xFF800000> : vector<16xf32>
    %28 = vector.multi_reduction <maximumf>, %26, %cst_13 [1] : vector<16x128xf32> to vector<16xf32>
    %29 = vector.shape_cast %28 : vector<16xf32> to vector<16x1xf32>
    %30 = arith.maximumf %27, %29 : vector<16x1xf32>
    %31 = vector.broadcast %30 : vector<16x1xf32> to vector<16x128xf32>
    %32 = arith.subf %12, %31 : vector<16x128xf32>
    %33 = math.exp %32 : vector<16x128xf32>
    %cst_14 = arith.constant 0.000000e+00 : f32
    %34 = vector.broadcast %cst_14 : f32 to vector<16x128xf32>
    %35 = arith.select %24, %33, %34 : vector<16x128xi1>, vector<16x128xf32>
    %c0_15 = arith.constant 0 : index
    %c0_16 = arith.constant 0 : index
    %36 = vector.load %arg8[%c0_15, %c0_16] : memref<16x1xf32, #tpu.memory_space<vmem>>, vector<16x1xf32>
    %37 = arith.subf %27, %30 : vector<16x1xf32>
    %38 = math.exp %37 : vector<16x1xf32>
    %39 = arith.mulf %36, %38 : vector<16x1xf32>
    %cst_17 = arith.constant dense<0.000000e+00> : vector<16xf32>
    %40 = vector.multi_reduction <add>, %35, %cst_17 [1] : vector<16x128xf32> to vector<16xf32>
    %41 = vector.shape_cast %40 : vector<16xf32> to vector<16x1xf32>
    %42 = arith.addf %39, %41 : vector<16x1xf32>
    %c0_18 = arith.constant 0 : index
    %c0_19 = arith.constant 0 : index
    %43 = vector.load %arg8[%c0_18, %c0_19] : memref<16x1xf32, #tpu.memory_space<vmem>>, vector<16x1xf32>
    tpu.vector_store %arg8[%c0_18, %c0_19], %42 {strides = array<i32>} : memref<16x1xf32, #tpu.memory_space<vmem>>, vector<16x1xf32>,
    %c0_20 = arith.constant 0 : index
    %c0_21 = arith.constant 0 : index
    %44 = vector.load %arg7[%c0_20, %c0_21] : memref<16x1xf32, #tpu.memory_space<vmem>>, vector<16x1xf32>
    tpu.vector_store %arg7[%c0_20, %c0_21], %30 {strides = array<i32>} : memref<16x1xf32, #tpu.memory_space<vmem>>, vector<16x1xf32>,
    %45 = arith.andi %10, %24 : vector<16x128xi1>
    %c0_22 = arith.constant 0 : index
    %c0_23 = arith.constant 0 : index
    %46 = vector.load %arg9[%c0_22, %c0_23] : memref<16x1xf32, #tpu.memory_space<vmem>>, vector<16x1xf32>
    %cst_24 = arith.constant 0.000000e+00 : f32
    %47 = vector.broadcast %cst_24 : f32 to vector<16x128xf32>
    %48 = arith.select %45, %12, %47 : vector<16x128xi1>, vector<16x128xf32>
    %cst_25 = arith.constant dense<0.000000e+00> : vector<16xf32>
    %49 = vector.multi_reduction <add>, %48, %cst_25 [1] : vector<16x128xf32> to vector<16xf32>
    %50 = vector.shape_cast %49 : vector<16xf32> to vector<16x1xf32>
    %51 = arith.addf %46, %50 : vector<16x1xf32>
    %c0_26 = arith.constant 0 : index
    %c0_27 = arith.constant 0 : index
    %52 = vector.load %arg9[%c0_26, %c0_27] : memref<16x1xf32, #tpu.memory_space<vmem>>, vector<16x1xf32>
    tpu.vector_store %arg9[%c0_26, %c0_27], %51 {strides = array<i32>} : memref<16x1xf32, #tpu.memory_space<vmem>>, vector<16x1xf32>,
    %c0_28 = arith.constant 0 : index
    %c0_29 = arith.constant 0 : index
    %53 = vector.load %arg10[%c0_28, %c0_29] : memref<16x1xf32, #tpu.memory_space<vmem>>, vector<16x1xf32>
    %54 = arith.extui %45 : vector<16x128xi1> to vector<16x128xi32>
    %55 = arith.sitofp %54 : vector<16x128xi32> to vector<16x128xf32>
    %cst_30 = arith.constant dense<0.000000e+00> : vector<16xf32>
    %56 = vector.multi_reduction <add>, %55, %cst_30 [1] : vector<16x128xf32> to vector<16xf32>
    %57 = vector.shape_cast %56 : vector<16xf32> to vector<16x1xf32>
    %58 = arith.addf %53, %57 : vector<16x1xf32>
    %c0_31 = arith.constant 0 : index
    %c0_32 = arith.constant 0 : index
    %59 = vector.load %arg10[%c0_31, %c0_32] : memref<16x1xf32, #tpu.memory_space<vmem>>, vector<16x1xf32>
    tpu.vector_store %arg10[%c0_31, %c0_32], %58 {strides = array<i32>} : memref<16x1xf32, #tpu.memory_space<vmem>>, vector<16x1xf32>,
    %c0_i32_33 = arith.constant 0 : i32
    %60 = arith.cmpi eq, %arg1, %c0_i32_33 : i32
    %61 = arith.extui %60 : i1 to i32
    %c0_i32_34 = arith.constant 0 : i32
    %62 = arith.cmpi ne, %61, %c0_i32_34 : i32
    scf.if %62 {
      %c0_35 = arith.constant 0 : index
      %c0_36 = arith.constant 0 : index
      %63 = vector.load %arg7[%c0_35, %c0_36] : memref<16x1xf32, #tpu.memory_space<vmem>>, vector<16x1xf32>
      %c0_37 = arith.constant 0 : index
      %c0_38 = arith.constant 0 : index
      %64 = vector.load %arg8[%c0_37, %c0_38] : memref<16x1xf32, #tpu.memory_space<vmem>>, vector<16x1xf32>
      %65 = math.log %64 : vector<16x1xf32>
      %66 = arith.addf %63, %65 : vector<16x1xf32>
      %c0_39 = arith.constant 0 : index
      %c0_40 = arith.constant 0 : index
      %67 = vector.load %arg10[%c0_39, %c0_40] : memref<16x1xf32, #tpu.memory_space<vmem>>, vector<16x1xf32>
      %c0_41 = arith.constant 0 : index
      %c0_42 = arith.constant 0 : index
      %68 = vector.load %arg9[%c0_41, %c0_42] : memref<16x1xf32, #tpu.memory_space<vmem>>, vector<16x1xf32>
      %69 = arith.mulf %67, %66 : vector<16x1xf32>
      %70 = arith.subf %68, %69 : vector<16x1xf32>
      %71 = arith.divf %70, %67 : vector<16x1xf32>
      %cst_43 = arith.constant -1.000000e+00 : f32
      %72 = vector.broadcast %cst_43 : f32 to vector<16x1xf32>
      %73 = arith.mulf %72, %71 : vector<16x1xf32>
      %74 = tpu.iota {dimensions = array<i32: 0>} : vector<16x1xi32>
      %c16_i32_44 = arith.constant 16 : i32
      %75 = arith.muli %arg0, %c16_i32_44 : i32
      %76 = vector.broadcast %75 : i32 to vector<16x1xi32>
      %77 = arith.addi %74, %76 : vector<16x1xi32>
      %c16_i32_45 = arith.constant 16 : i32
      %78 = vector.broadcast %c16_i32_45 : i32 to vector<16x1xi32>
      %79 = arith.cmpi slt, %77, %78 : vector<16x1xi32>
      %cst_46 = arith.constant 0.000000e+00 : f32
      %80 = vector.broadcast %cst_46 : f32 to vector<16x1xf32>
      %81 = arith.select %79, %73, %80 : vector<16x1xi1>, vector<16x1xf32>
      %c0_47 = arith.constant 0 : index
      %c0_48 = arith.constant 0 : index
      %82 = vector.load %arg6[%c0_47, %c0_48] : memref<16x1xf32, #tpu.memory_space<vmem>>, vector<16x1xf32>
      tpu.vector_store %arg6[%c0_47, %c0_48], %81 {strides = array<i32>} : memref<16x1xf32, #tpu.memory_space<vmem>>, vector<16x1xf32>,
    } else {
    }
    return
  }
  func.func @transform_0(%arg0: i32, %arg1: i32) -> (i32, i32) {
    %c0_i32 = arith.constant 0 : i32
    %c0_i32_0 = arith.constant 0 : i32
    return %arg0, %c0_i32 : i32, i32
  }
  func.func @transform_1(%arg0: i32, %arg1: i32) -> (i32, i32) {
    %c0_i32 = arith.constant 0 : i32
    %c0_i32_0 = arith.constant 0 : i32
    return %c0_i32, %arg1 : i32, i32
  }
  func.func @transform_2(%arg0: i32, %arg1: i32) -> (i32, i32) {
    %c0_i32 = arith.constant 0 : i32
    %c0_i32_0 = arith.constant 0 : i32
    return %arg0, %c0_i32 : i32, i32
  }
  func.func @transform_3(%arg0: i32, %arg1: i32) -> (i32, i32) {
    %c0_i32 = arith.constant 0 : i32
    %c0_i32_0 = arith.constant 0 : i32
    return %c0_i32, %arg1 : i32, i32
  }
  func.func @transform_4(%arg0: i32, %arg1: i32) -> (i32, i32) {
    %c0_i32 = arith.constant 0 : i32
    %c0_i32_0 = arith.constant 0 : i32
    return %arg0, %c0_i32 : i32, i32
  }
}

</mosaic_0001>

<bundles_post_ra>
// kernel: tpu_custom_call.1
= control target key start
LH: loop header
LB: loop body
LE: loop exit
PB: predicated region body
PF: predicated region fallthrough
CT: control target
= control target key end

     0   :  { %v290_v0 = vmov 0.0   ;;  %vm291_vm0 = vmmov 0   ;;  %vm54_vm1 = vcmask 261120   ;;  %v292_v4 = vmov 0   ;;  %s400_s3 = inlined_call_operand.vmem [shape: bf16[32,128], index: 3, kind: input, shape index: {}]   ;;  %s401_s2 = inlined_call_operand.vmem [shape: bf16[16,32], index: 2, kind: input, shape index: {}]   ;;  %s402_s0 = inlined_call_operand.vmem [shape: s32[16,1], index: 0, kind: input, shape index: {}]   ;;  %s403_s1 = inlined_call_operand.vmem [shape: s32[1,128], index: 1, kind: input, shape index: {}]   ;;  %s404_s4 = inlined_call_operand.vmem [shape: f32[16,1], index: 4, kind: output, shape index: {}]  }
   0x1   :  { %257 = vmatprep.subr.bf16.mxu0 %v290_v0  ;;  %v271_v1 = vld [vmem:[%s400_s3] sm:$0xff]   ;;  %261 = vmatprep.mubr.msk.bf16.mxu0 %vm291_vm0, %v290_v0  ;;  %v272_v2 = vld [vmem:[%s400_s3 + $0x8] sm:$0xff]   ;;  %vm22_vm2 = vcmask 7168   ;;  %v293_v5 = vmov -1e+30   ;;  %v116_v6 = vlaneseq }
   0x2   :  { %258 = vmatpush3.bf16.msra.mxu0 %v271_v1  ;;  %v273_v3 = vld [vmem:[%s401_s2] sm:$0xff]   ;;  %270 = vset.pattern.permute.xlu0 %v292_v4  ;;  %23 = vst.msk [vmem:[#allocation2] sm:$0xff] %vm22_vm2, %v293_v5  ;;  %24 = vst.msk [vmem:[#allocation2 + $0x8] sm:$0xff] %vm22_vm2, %v293_v5  ;;  %v100_v29 = vld [vmem:[%s402_s0 + $0x8] sm:$0xff] }
   0x3   :  { %259 = vmatprep.subr.bf16.mxu0 %v290_v0  ;;  %269 = vset.pattern.permute.xlu1 %v292_v4  ;;  %25 = vst.msk [vmem:[#allocation3] sm:$0xff] %vm22_vm2, %v290_v0  ;;  %26 = vst.msk [vmem:[#allocation3 + $0x8] sm:$0xff] %vm22_vm2, %v290_v0  ;;  %v117_v7 = vshrl.u32 %v116_v6, 7  ;;  %v124_v8 = vand.u32 127, %v116_v6  ;;  %v99_v20 = vld [vmem:[%s402_s0] sm:$0xff] }
   0x4   :  { %27 = vst.msk [vmem:[#allocation4] sm:$0xff] %vm22_vm2, %v290_v0  ;;  %28 = vst.msk [vmem:[#allocation4 + $0x8] sm:$0xff] %vm22_vm2, %v290_v0  ;;  %v251_v30 = vld [vmem:[%s403_s1] ss:$0 sm:$0xff] }
   0x5   :  { %29 = vst.msk [vmem:[#allocation5] sm:$0xff] %vm22_vm2, %v290_v0  ;;  %30 = vst.msk [vmem:[#allocation5 + $0x8] sm:$0xff] %vm22_vm2, %v290_v0  ;;  %vm128_vm3 = vcmp.ne.s32.totalorder %v117_v7, %v124_v8  ;;  %vm130_vm4 = vcmp.lt.s32.totalorder %v124_v8, 16  ;;  %v118_v9 = vadd.s32 8, %v117_v7 }
   0x6   :  { %260 = vmatpush3.bf16.msra.mxu0 %v272_v2  ;;  %vm345_vm5 = vmand %vm128_vm3, %vm130_vm4 }
   0x7   :  { %vm129_vm6 = vcmp.ne.s32.totalorder %v118_v9, %v124_v8 }
   0x8   :  { %vm351_vm7 = vmand %vm129_vm6, %vm130_vm4 }
   0x9   :  { %262 = vmatmul.mubr.msk.bf16.vlgmr.msra.gmra.mrb[0].mxu0 %vm54_vm1, %v273_v3  ;;  %v135_v21 = vld [vmem:[#allocation2] sm:$0xff]  ;;  %v136_v24 = vld [vmem:[#allocation2 + $0x8] sm:$0xff] }
   0xa   :  { %v161_v54 = vld [vmem:[#allocation3] sm:$0xff]  ;;  %v162_v58 = vld [vmem:[#allocation3 + $0x8] sm:$0xff] }
   0xb   :  { %v184_v3 = vld [vmem:[#allocation4] sm:$0xff]  ;;  %v185_v8 = vld [vmem:[#allocation4 + $0x8] sm:$0xff] }
   0xc   :  { %v196_v48 = vld [vmem:[#allocation5] sm:$0xff]  ;;  %v197_v63 = vld [vmem:[#allocation5 + $0x8] sm:$0xff] }
  0xdc   :  { %v92_v10 = vpop.f32.mrb[0].mxu0 }
  0xdd   :  { %v114_v12 = vmul.f32 14.285714, %v92_v10  ;;  %v263_v13 = vpop.f32.mrb[1].mxu0 }
  0xde   :  { %v95_v14 = vpop.f32.mrb[2].mxu0 }
  0xdf   :  { %v115_v15 = vmul.f32 14.285714, %v95_v14  ;;  %v264_v16 = vpop.f32.mrb[3].mxu0  ;;  %v133_v17 = vsel %vm345_vm5, %v114_v12, -1e+30 }
  0xe0   :  { %137 = vmax.xlane.f32.xlu0 %v133_v17 }
  0xe1   :  { %v134_v19 = vsel %vm351_vm7, %v115_v15, -1e+30 }
  0xe4   :  { %139 = vmax.xlane.f32.xlu0 %v134_v19 }
  0xfa   :  { %103 = vperm.xlu0 %270, %v99_v20  }
 0x16d   :  { %v138_v22 = vpop.xlane.xlu0 %137 }
 0x16e   :  { %v141_v23 = vmax.f32 %v135_v21, %v138_v22 }
 0x170   :  { %v163_v25 = vsub.f32 %v135_v21, %v141_v23  ;;  %180 = vst.msk [vmem:[#allocation2] sm:$0xff] %vm22_vm2, %v141_v23  ;;  %145 = vperm.xlu1 %269, %v141_v23  }
 0x171   :  { %v140_v26 = vpop.xlane.xlu0 %139 }
 0x172   :  { %v142_v27 = vmax.f32 %v136_v24, %v140_v26  ;;  %v165_v51 = vmul.f32 1.442695, %v163_v25 }
 0x174   :  { %v164_v28 = vsub.f32 %v136_v24, %v142_v27  ;;  %181 = vst.msk [vmem:[#allocation2 + $0x8] sm:$0xff] %vm22_vm2, %v142_v27  ;;  %150 = vperm.xlu1 %269, %v142_v27  }
 0x176   :  { %v167_v52 = vmul.f32 1.442695, %v164_v28 }
 0x177   :  { %v213_v14 = vld [vmem:[#allocation2] sm:$0xff] }
 0x178   :  { %106 = vperm.xlu1 %269, %v100_v29  }
 0x179   :  { %v104_v31 = vpop.permute.xlu0 %103 }
 0x17a   :  { %vm112_vm8 = vcmp.eq.s32.totalorder %v104_v31, %v251_v30 }
 0x17b   :  { %vm370_vm9 = vmand %vm112_vm8, %vm345_vm5  ;;  %v214_v20 = vld [vmem:[#allocation2 + $0x8] sm:$0xff] }
 0x17c   :  { %v252_v33 = vsel %vm370_vm9, 1.0, %v290_v0  ;;  %v186_v46 = vsel %vm370_vm9, %v114_v12, 0.0 }
 0x17d   :  { %202 = vadd.xlane.f32.xlu0 %v252_v33 }
 0x1ef   :  { %v146_v34 = vpop.permute.xlu1 %145 }
 0x1f0   :  { %v153_v35 = vsub.f32 %v114_v12, %v146_v34 }
 0x1f2   :  { %v155_v36 = vmul.f32 1.442695, %v153_v35 }
 0x1f3   :  { %v151_v37 = vpop.permute.xlu1 %150 }
 0x1f4   :  { %274 = vpow2.f32 %v155_v36  ;;  %v154_v38 = vsub.f32 %v115_v15, %v151_v37 }
 0x1f6   :  { %v157_v39 = vmul.f32 1.442695, %v154_v38 }
 0x1f7   :  { %v107_v41 = vpop.permute.xlu1 %106 }
 0x1f8   :  { %276 = vpow2.f32 %v157_v39  ;;  %vm113_vm10 = vcmp.eq.s32.totalorder %v107_v41, %v251_v30 }
 0x1f9   :  { %vm183_vm11 = vmand %vm113_vm10, %vm351_vm7  ;;  %278 = vpow2.f32 %v165_v51 }
 0x1fa   :  { %v253_v45 = vsel %vm183_vm11, 1.0, %v290_v0  ;;  %v187_v47 = vsel %vm183_vm11, %v115_v15, 0.0  ;;  %280 = vpow2.f32 %v167_v52 }
 0x1fe   :  { %v275_v40 = vpop.eup %274 }
 0x1ff   :  { %v159_v42 = vsel %vm345_vm5, %v275_v40, 0.0 }
 0x200   :  { %171 = vadd.xlane.f32.xlu1 %v159_v42 }
 0x202   :  { %v277_v43 = vpop.eup %276 }
 0x203   :  { %v160_v44 = vsel %vm351_vm7, %v277_v43, 0.0  ;;  %v279_v53 = vpop.eup %278 }
 0x204   :  { %173 = vadd.xlane.f32.xlu1 %v160_v44  ;;  %v169_v55 = vmul.f32 %v279_v53, %v161_v54  ;;  %v281_v56 = vpop.eup %280 }
 0x205   :  { %v170_v60 = vmul.f32 %v281_v56, %v162_v58 }
 0x208   :  { %204 = vadd.xlane.f32.xlu1 %v253_v45 }
 0x20a   :  { %v203_v49 = vpop.xlane.xlu0 %202 }
 0x20b   :  { %v206_v50 = vadd.f32 %v203_v49, %v196_v48 }
 0x20c   :  { %188 = vadd.xlane.f32.xlu1 %v186_v46 }
 0x20d   :  { %208 = vst.msk [vmem:[#allocation5] sm:$0xff] %vm22_vm2, %v206_v50 }
 0x210   :  { %190 = vadd.xlane.f32.xlu1 %v187_v47 }
 0x214   :  { %v223_v7 = vld [vmem:[#allocation5] sm:$0xff] }
 0x28d   :  { %v172_v57 = vpop.xlane.xlu1 %171 }
 0x28e   :  { %v175_v59 = vadd.f32 %v172_v57, %v169_v55 }
 0x290   :  { %178 = vst.msk [vmem:[#allocation3] sm:$0xff] %vm22_vm2, %v175_v59 }
 0x291   :  { %v174_v61 = vpop.xlane.xlu1 %173 }
 0x292   :  { %v176_v62 = vadd.f32 %v174_v61, %v170_v60 }
 0x294   :  { %179 = vst.msk [vmem:[#allocation3 + $0x8] sm:$0xff] %vm22_vm2, %v176_v62 }
 0x295   :  { %v205_v0 = vpop.xlane.xlu1 %204 }
 0x296   :  { %v207_v1 = vadd.f32 %v205_v0, %v197_v63 }
 0x297   :  { %v215_v2 = vld [vmem:[#allocation3] sm:$0xff] }
 0x298   :  { %282 = vlog2.f32 %v215_v2  ;;  %209 = vst.msk [vmem:[#allocation5 + $0x8] sm:$0xff] %vm22_vm2, %v207_v1 }
 0x299   :  { %v189_v4 = vpop.xlane.xlu1 %188 }
 0x29a   :  { %v192_v5 = vadd.f32 %v189_v4, %v184_v3 }
 0x29b   :  { %v216_v6 = vld [vmem:[#allocation3 + $0x8] sm:$0xff] }
 0x29c   :  { %284 = vlog2.f32 %v216_v6  ;;  %194 = vst.msk [vmem:[#allocation4] sm:$0xff] %vm22_vm2, %v192_v5 }
 0x29d   :  { %v191_v9 = vpop.xlane.xlu1 %190  ;;  %286 = vrcp.f32 %v223_v7 }
 0x29e   :  { %v193_v10 = vadd.f32 %v191_v9, %v185_v8 }
 0x29f   :  { %v224_v11 = vld [vmem:[#allocation5 + $0x8] sm:$0xff] }
 0x2a0   :  { %195 = vst.msk [vmem:[#allocation4 + $0x8] sm:$0xff] %vm22_vm2, %v193_v10  ;;  %288 = vrcp.f32 %v224_v11 }
 0x2a2   :  { %v283_v12 = vpop.eup %282 }
 0x2a3   :  { %v218_v13 = vmul.f32 0.6931472, %v283_v12  ;;  %v225_v21 = vld [vmem:[#allocation4] sm:$0xff] }
 0x2a5   :  { %v221_v15 = vadd.f32 %v218_v13, %v213_v14 }
 0x2a6   :  { %v285_v16 = vpop.eup %284 }
 0x2a7   :  { %v220_v17 = vmul.f32 0.6931472, %v285_v16  ;;  %v227_v18 = vmul.f32 %v223_v7, %v221_v15  ;;  %v287_v19 = vpop.eup %286  ;;  %v226_v26 = vld [vmem:[#allocation4 + $0x8] sm:$0xff] }
 0x2a9   :  { %v222_v22 = vadd.f32 %v220_v17, %v214_v20  ;;  %v229_v23 = vsub.f32 %v225_v21, %v227_v18 }
 0x2aa   :  { %v289_v29 = vpop.eup %288 }
 0x2ab   :  { %v228_v24 = vmul.f32 %v224_v11, %v222_v22  ;;  %v232_v25 = vmul.f32 %v287_v19, %v229_v23 }
 0x2ad   :  { %v235_v27 = vmul.f32 -1.0, %v232_v25  ;;  %v230_v28 = vsub.f32 %v226_v26, %v228_v24 }
 0x2af   :  { %241 = vst.msk [vmem:[%s404_s4] sm:$0xff] %vm22_vm2, %v235_v27  ;;  %v234_v30 = vmul.f32 %v289_v29, %v230_v28 }
 0x2b1   :  { %v236_v31 = vmul.f32 -1.0, %v234_v30 }
 0x2b3   :  { %242 = vst.msk [vmem:[%s404_s4 + $0x8] sm:$0xff] %vm22_vm2, %v236_v31 }

</bundles_post_ra>
